<compile_context>
chip_gen: v7x
topology: tpu7x:2x2x1
jax: 0.10.0
libtpu: 0.0.40
codegen_flags: <defaults>
</compile_context>

<pallas_src>
import jax
import jax.numpy as jnp
from jax import lax
from jax.experimental import pallas as pl
from jax.experimental.pallas import tpu as pltpu

_EPS = 1e-5          # torch.nn.LayerNorm default eps
_BATCH_TILE = 256    # batch tile for the gridded (large-B) path


def _elu(h):
    # ELU(alpha=1): x if x > 0 else exp(x) - 1.  The exp of the untaken branch
    # may overflow to +inf, but a select discards it without NaNs.
    return jnp.where(h > 0.0, h, jnp.exp(h) - 1.0)


def _ln_no_affine(h, inv_n):
    # One-pass LayerNorm: var = E[x^2] - mean^2.  Affine is folded into the
    # following Linear at prep time, so no gamma/beta here.
    s = jnp.sum(h, axis=-1, keepdims=True)
    s2 = jnp.sum(h * h, axis=-1, keepdims=True)
    mean = s * inv_n
    var = s2 * inv_n - mean * mean
    return (h - mean) * lax.rsqrt(var + _EPS)


def _q_kernel(obs_ref, act_ref,
              w1o_ref, w1a_ref, b1_ref,
              w2_ref, b2_ref,
              w3_ref, b3_ref,
              q_ref):
    obs = obs_ref[...]
    act = act_ref[...]
    inv_d = 1.0 / float(obs.shape[-1] + act.shape[-1])

    # --- LayerNorm over the virtual concat [obs, action] (never materialized).
    #     One-pass stats over both pieces; gamma0/beta0 folded into W1/b1.
    s = (jnp.sum(obs, axis=-1, keepdims=True)
         + jnp.sum(act, axis=-1, keepdims=True))
    s2 = (jnp.sum(obs * obs, axis=-1, keepdims=True)
          + jnp.sum(act * act, axis=-1, keepdims=True))
    mean = s * inv_d
    var = s2 * inv_d - mean * mean
    inv = lax.rsqrt(var + _EPS)
    xo = (obs - mean) * inv
    xa = (act - mean) * inv

    # --- Linear(D, 400), split across the concat boundary; f32 accumulation.
    h = (jnp.dot(xo.astype(jnp.bfloat16), w1o_ref[...],
                 preferred_element_type=jnp.float32)
         + jnp.dot(xa.astype(jnp.bfloat16), w1a_ref[...],
                   preferred_element_type=jnp.float32)
         + b1_ref[...])
    h = _elu(h)

    # --- LayerNorm(400) (affine folded into W2/b2) -> Linear(400,300) -> ELU
    h = _ln_no_affine(h, 1.0 / 400.0)
    h = jnp.dot(h.astype(jnp.bfloat16), w2_ref[...],
                preferred_element_type=jnp.float32) + b2_ref[...]
    h = _elu(h)

    # --- LayerNorm(300) (affine folded into w3/b3) -> Linear(300,1) as a VPU
    #     multiply + lane reduction (avoids a nearly-empty N=1 MXU pass).
    h = _ln_no_affine(h, 1.0 / 300.0)
    q_ref[...] = jnp.sum(h * w3_ref[...], axis=-1, keepdims=True) + b3_ref[...]


def prepare_params(params, o_dim):
    """One-time conversion of PyTorch-layout params into the kernel layout.

    Hoisted out of the per-call hot path.  LayerNorm affines are folded into
    the following Linear in f32; the two big matrices are cast to bf16 only
    after the fold so weight rounding happens once, post-fold.
        LN(x)*g + b  then  x@W^T + c   ==   LN(x) @ (g[:,None]*W^T) + (c + b@W^T)
    """
    (g0, bt0), (w1, b1), (g1, bt1), (w2, b2), (g2, bt2), (w3, b3) = params
    f32, bf16 = jnp.float32, jnp.bfloat16

    w1t = w1.T.astype(f32) * g0[:, None]          # (D, 400)
    b1f = b1 + bt0 @ w1.T                         # (400,)
    w2t = w2.T.astype(f32) * g1[:, None]          # (400, 300)
    b2f = b2 + bt1 @ w2.T                         # (300,)
    w3r = (w3.reshape(-1) * g2).reshape(1, -1)    # (1, 300) row for VPU reduce
    b3f = (b3 + bt2 @ w3.T).reshape(1, 1)         # (1, 1)

    return {
        "w1o": w1t[:o_dim].astype(bf16),          # (o_dim, 400)
        "w1a": w1t[o_dim:].astype(bf16),          # (a_dim, 400)
        "b1": b1f.reshape(1, -1).astype(f32),
        "w2": w2t.astype(bf16),                   # (400, 300)
        "b2": b2f.reshape(1, -1).astype(f32),
        "w3": w3r.astype(f32),
        "b3": b3f.astype(f32),
    }


_PARAM_ORDER = ("w1o", "w1a", "b1", "w2", "b2", "w3", "b3")


@jax.jit
def q_forward(obs, action, prep):
    obs = obs.astype(jnp.float32)
    action = action.astype(jnp.float32)
    B, o_dim = obs.shape
    a_dim = action.shape[1]
    weights = [prep[k] for k in _PARAM_ORDER]

    if B >= 2 * _BATCH_TILE and B % _BATCH_TILE == 0:
        # Training-size batches: 1-D parallel grid over the batch.  Weights
        # use a constant index_map (stay VMEM-resident across grid steps);
        # on v7x the "parallel" axis is sharded across both TensorCores.
        tm = _BATCH_TILE

        def w_spec(a):
            n = a.ndim
            return pl.BlockSpec(a.shape, lambda i, n=n: (0,) * n)

        in_specs = ([pl.BlockSpec((tm, o_dim), lambda i: (i, 0)),
                     pl.BlockSpec((tm, a_dim), lambda i: (i, 0))]
                    + [w_spec(a) for a in weights])
        return pl.pallas_call(
            _q_kernel,
            out_shape=jax.ShapeDtypeStruct((B, 1), jnp.float32),
            grid=(B // tm,),
            in_specs=in_specs,
            out_specs=pl.BlockSpec((tm, 1), lambda i: (i, 0)),
            compiler_params=pltpu.CompilerParams(
                dimension_semantics=("parallel",)),
        )(obs, action, *weights)

    # Small-batch (rollout) path: single gridless block -- total footprint is
    # well under 1 MiB so default scoped VMEM is plenty and a grid would be
    # pure per-step overhead.
    def full_spec(a):
        n = a.ndim
        return pl.BlockSpec(a.shape, lambda n=n: (0,) * n)

    arrays = [obs, action] + weights
    return pl.pallas_call(
        _q_kernel,
        out_shape=jax.ShapeDtypeStruct((B, 1), jnp.float32),
        in_specs=[full_spec(a) for a in arrays],
        out_specs=pl.BlockSpec((B, 1), lambda: (0, 0)),
    )(*arrays)


def init_q_params(key, o_dim, a_dim):
    """PyTorch-layout params: (out,in) weights, 1-D biases, LN affine params."""
    D = o_dim + a_dim

    def linear(k, out_f, in_f):
        kw, kb = jax.random.split(k)
        bound = 1.0 / float(in_f) ** 0.5
        w = jax.random.uniform(kw, (out_f, in_f), jnp.float32, -bound, bound)
        b = jax.random.uniform(kb, (out_f,), jnp.float32, -bound, bound)
        return w, b

    def layernorm(k, n):
        # PyTorch default is gamma=1, beta=0; perturb slightly so the test
        # actually exercises the affine-fold path.
        kg, kb = jax.random.split(k)
        g = 1.0 + 0.1 * jax.random.uniform(kg, (n,), jnp.float32, -1.0, 1.0)
        b = 0.1 * jax.random.uniform(kb, (n,), jnp.float32, -1.0, 1.0)
        return g, b

    k = jax.random.split(key, 6)
    return [layernorm(k[0], D), linear(k[1], 400, D),
            layernorm(k[2], 400), linear(k[3], 300, 400),
            layernorm(k[4], 300), linear(k[5], 1, 300)]


def _reference(obs, action, params):
    """Pure-JAX f32 reference matching the PyTorch module."""
    x = jnp.concatenate([obs, action], axis=-1)
    (g0, bt0), (w1, b1), (g1, bt1), (w2, b2), (g2, bt2), (w3, b3) = params

    def ln(v, g, b):
        mu = jnp.mean(v, axis=-1, keepdims=True)
        var = jnp.mean((v - mu) ** 2, axis=-1, keepdims=True)
        return (v - mu) / jnp.sqrt(var + _EPS) * g + b

    def elu(v):
        return jnp.where(v > 0, v, jnp.expm1(v))

    h = ln(x, g0, bt0)
    h = elu(h @ w1.T + b1)
    h = ln(h, g1, bt1)
    h = elu(h @ w2.T + b2)
    h = ln(h, g2, bt2)
    return h @ w3.T + b3


if __name__ == "__main__":
    key = jax.random.PRNGKey(0)
    k_obs, k_act, k_par, k_obs2, k_act2 = jax.random.split(key, 5)

    o_dim, a_dim = 24, 8
    params = init_q_params(k_par, o_dim, a_dim)
    prep = prepare_params(params, o_dim)   # one-time; outside the hot path

    # Small-batch (gridless) path, as used per-transition in ERL/SAC rollout.
    B = 2
    obs = jax.random.normal(k_obs, (B, o_dim), jnp.float32)
    action = jax.random.normal(k_act, (B, a_dim), jnp.float32)
    q = q_forward(obs, action, prep)
    jax.block_until_ready(q)
    ref = _reference(obs, action, params)
    assert q.shape == (B, 1)
    # bf16 weights in the two big matmuls -> loosened tolerance vs f32 reference.
    assert jnp.allclose(q, ref, atol=5e-2, rtol=5e-2), (q, ref)

    # Training-size batch: exercises the batch-parallel grid path.
    Bb = 512
    obs_b = jax.random.normal(k_obs2, (Bb, o_dim), jnp.float32)
    act_b = jax.random.normal(k_act2, (Bb, a_dim), jnp.float32)
    q_b = q_forward(obs_b, act_b, prep)
    jax.block_until_ready(q_b)
    ref_b = _reference(obs_b, act_b, params)
    assert q_b.shape == (Bb, 1)
    assert jnp.allclose(q_b, ref_b, atol=5e-2, rtol=5e-2), "batched path mismatch"

    print("KERNEL_OK")
</pallas_src>

<mosaic_0001>
module attributes {stable_mosaic.version = 11 : i64} {
  func.func @_q_kernel(%arg0: memref<2x24xf32, #tpu.memory_space<vmem>>, %arg1: memref<2x8xf32, #tpu.memory_space<vmem>>, %arg2: memref<24x400xbf16, #tpu.memory_space<vmem>>, %arg3: memref<8x400xbf16, #tpu.memory_space<vmem>>, %arg4: memref<1x400xf32, #tpu.memory_space<vmem>>, %arg5: memref<400x300xbf16, #tpu.memory_space<vmem>>, %arg6: memref<1x300xf32, #tpu.memory_space<vmem>>, %arg7: memref<1x300xf32, #tpu.memory_space<vmem>>, %arg8: memref<1x1xf32, #tpu.memory_space<vmem>>, %arg9: memref<2x1xf32, #tpu.memory_space<vmem>>) attributes {dimension_semantics = [], scalar_prefetch = 0 : i64, scratch_operands = 0 : i64, tpu.core_type = #tpu.core_type<tc>} {
    %c0 = arith.constant 0 : index
    %c0_0 = arith.constant 0 : index
    %0 = vector.load %arg0[%c0, %c0_0] : memref<2x24xf32, #tpu.memory_space<vmem>>, vector<2x24xf32>
    %c0_1 = arith.constant 0 : index
    %c0_2 = arith.constant 0 : index
    %1 = vector.load %arg1[%c0_1, %c0_2] : memref<2x8xf32, #tpu.memory_space<vmem>>, vector<2x8xf32>
    %cst = arith.constant dense<0.000000e+00> : vector<2xf32>
    %2 = vector.multi_reduction <add>, %0, %cst [1] : vector<2x24xf32> to vector<2xf32>
    %3 = vector.shape_cast %2 : vector<2xf32> to vector<2x1xf32>
    %cst_3 = arith.constant dense<0.000000e+00> : vector<2xf32>
    %4 = vector.multi_reduction <add>, %1, %cst_3 [1] : vector<2x8xf32> to vector<2xf32>
    %5 = vector.shape_cast %4 : vector<2xf32> to vector<2x1xf32>
    %6 = arith.addf %3, %5 : vector<2x1xf32>
    %7 = arith.mulf %0, %0 : vector<2x24xf32>
    %cst_4 = arith.constant dense<0.000000e+00> : vector<2xf32>
    %8 = vector.multi_reduction <add>, %7, %cst_4 [1] : vector<2x24xf32> to vector<2xf32>
    %9 = vector.shape_cast %8 : vector<2xf32> to vector<2x1xf32>
    %10 = arith.mulf %1, %1 : vector<2x8xf32>
    %cst_5 = arith.constant dense<0.000000e+00> : vector<2xf32>
    %11 = vector.multi_reduction <add>, %10, %cst_5 [1] : vector<2x8xf32> to vector<2xf32>
    %12 = vector.shape_cast %11 : vector<2xf32> to vector<2x1xf32>
    %13 = arith.addf %9, %12 : vector<2x1xf32>
    %cst_6 = arith.constant 3.125000e-02 : f32
    %14 = vector.broadcast %cst_6 : f32 to vector<2x1xf32>
    %15 = arith.mulf %6, %14 : vector<2x1xf32>
    %cst_7 = arith.constant 3.125000e-02 : f32
    %16 = vector.broadcast %cst_7 : f32 to vector<2x1xf32>
    %17 = arith.mulf %13, %16 : vector<2x1xf32>
    %18 = arith.mulf %15, %15 : vector<2x1xf32>
    %19 = arith.subf %17, %18 : vector<2x1xf32>
    %cst_8 = arith.constant 9.99999974E-6 : f32
    %20 = vector.broadcast %cst_8 : f32 to vector<2x1xf32>
    %21 = arith.addf %19, %20 : vector<2x1xf32>
    %22 = math.rsqrt %21 : vector<2x1xf32>
    %23 = vector.broadcast %15 : vector<2x1xf32> to vector<2x24xf32>
    %24 = arith.subf %0, %23 : vector<2x24xf32>
    %25 = vector.broadcast %22 : vector<2x1xf32> to vector<2x24xf32>
    %26 = arith.mulf %24, %25 : vector<2x24xf32>
    %27 = vector.broadcast %15 : vector<2x1xf32> to vector<2x8xf32>
    %28 = arith.subf %1, %27 : vector<2x8xf32>
    %29 = vector.broadcast %22 : vector<2x1xf32> to vector<2x8xf32>
    %30 = arith.mulf %28, %29 : vector<2x8xf32>
    %31 = arith.truncf %26 : vector<2x24xf32> to vector<2x24xbf16>
    %c0_9 = arith.constant 0 : index
    %c0_10 = arith.constant 0 : index
    %32 = vector.load %arg2[%c0_9, %c0_10] : memref<24x400xbf16, #tpu.memory_space<vmem>>, vector<24x400xbf16>
    %cst_11 = arith.constant dense<0.000000e+00> : vector<2x400xf32>
    %33 = tpu.matmul %31, %32, %cst_11 {dimension_numbers = #tpu.dot_dimension_numbers<[1], [0], [0], [1], [0, 0, 1, 1], [], []>} : vector<2x24xbf16>, vector<24x400xbf16>, vector<2x400xf32> -> vector<2x400xf32>
    %34 = arith.truncf %30 : vector<2x8xf32> to vector<2x8xbf16>
    %c0_12 = arith.constant 0 : index
    %c0_13 = arith.constant 0 : index
    %35 = vector.load %arg3[%c0_12, %c0_13] : memref<8x400xbf16, #tpu.memory_space<vmem>>, vector<8x400xbf16>
    %cst_14 = arith.constant dense<0.000000e+00> : vector<2x400xf32>
    %36 = tpu.matmul %34, %35, %cst_14 {dimension_numbers = #tpu.dot_dimension_numbers<[1], [0], [0], [1], [0, 0, 1, 1], [], []>} : vector<2x8xbf16>, vector<8x400xbf16>, vector<2x400xf32> -> vector<2x400xf32>
    %37 = arith.addf %33, %36 : vector<2x400xf32>
    %c0_15 = arith.constant 0 : index
    %c0_16 = arith.constant 0 : index
    %38 = vector.load %arg4[%c0_15, %c0_16] : memref<1x400xf32, #tpu.memory_space<vmem>>, vector<1x400xf32>
    %39 = vector.broadcast %38 : vector<1x400xf32> to vector<2x400xf32>
    %40 = arith.addf %37, %39 : vector<2x400xf32>
    %cst_17 = arith.constant 0.000000e+00 : f32
    %41 = vector.broadcast %cst_17 : f32 to vector<2x400xf32>
    %42 = arith.cmpf ogt, %40, %41 : vector<2x400xf32>
    %43 = math.exp %40 : vector<2x400xf32>
    %cst_18 = arith.constant 1.000000e+00 : f32
    %44 = vector.broadcast %cst_18 : f32 to vector<2x400xf32>
    %45 = arith.subf %43, %44 : vector<2x400xf32>
    %46 = arith.select %42, %40, %45 : vector<2x400xi1>, vector<2x400xf32>
    %cst_19 = arith.constant dense<0.000000e+00> : vector<2xf32>
    %47 = vector.multi_reduction <add>, %46, %cst_19 [1] : vector<2x400xf32> to vector<2xf32>
    %48 = vector.shape_cast %47 : vector<2xf32> to vector<2x1xf32>
    %49 = arith.mulf %46, %46 : vector<2x400xf32>
    %cst_20 = arith.constant dense<0.000000e+00> : vector<2xf32>
    %50 = vector.multi_reduction <add>, %49, %cst_20 [1] : vector<2x400xf32> to vector<2xf32>
    %51 = vector.shape_cast %50 : vector<2xf32> to vector<2x1xf32>
    %cst_21 = arith.constant 2.500000e-03 : f32
    %52 = vector.broadcast %cst_21 : f32 to vector<2x1xf32>
    %53 = arith.mulf %48, %52 : vector<2x1xf32>
    %cst_22 = arith.constant 2.500000e-03 : f32
    %54 = vector.broadcast %cst_22 : f32 to vector<2x1xf32>
    %55 = arith.mulf %51, %54 : vector<2x1xf32>
    %56 = arith.mulf %53, %53 : vector<2x1xf32>
    %57 = arith.subf %55, %56 : vector<2x1xf32>
    %58 = vector.broadcast %53 : vector<2x1xf32> to vector<2x400xf32>
    %59 = arith.subf %46, %58 : vector<2x400xf32>
    %cst_23 = arith.constant 9.99999974E-6 : f32
    %60 = vector.broadcast %cst_23 : f32 to vector<2x1xf32>
    %61 = arith.addf %57, %60 : vector<2x1xf32>
    %62 = math.rsqrt %61 : vector<2x1xf32>
    %63 = vector.broadcast %62 : vector<2x1xf32> to vector<2x400xf32>
    %64 = arith.mulf %59, %63 : vector<2x400xf32>
    %65 = arith.truncf %64 : vector<2x400xf32> to vector<2x400xbf16>
    %c0_24 = arith.constant 0 : index
    %c0_25 = arith.constant 0 : index
    %66 = vector.load %arg5[%c0_24, %c0_25] : memref<400x300xbf16, #tpu.memory_space<vmem>>, vector<400x300xbf16>
    %cst_26 = arith.constant dense<0.000000e+00> : vector<2x300xf32>
    %67 = tpu.matmul %65, %66, %cst_26 {dimension_numbers = #tpu.dot_dimension_numbers<[1], [0], [0], [1], [0, 0, 1, 1], [], []>} : vector<2x400xbf16>, vector<400x300xbf16>, vector<2x300xf32> -> vector<2x300xf32>
    %c0_27 = arith.constant 0 : index
    %c0_28 = arith.constant 0 : index
    %68 = vector.load %arg6[%c0_27, %c0_28] : memref<1x300xf32, #tpu.memory_space<vmem>>, vector<1x300xf32>
    %69 = vector.broadcast %68 : vector<1x300xf32> to vector<2x300xf32>
    %70 = arith.addf %67, %69 : vector<2x300xf32>
    %cst_29 = arith.constant 0.000000e+00 : f32
    %71 = vector.broadcast %cst_29 : f32 to vector<2x300xf32>
    %72 = arith.cmpf ogt, %70, %71 : vector<2x300xf32>
    %73 = math.exp %70 : vector<2x300xf32>
    %cst_30 = arith.constant 1.000000e+00 : f32
    %74 = vector.broadcast %cst_30 : f32 to vector<2x300xf32>
    %75 = arith.subf %73, %74 : vector<2x300xf32>
    %76 = arith.select %72, %70, %75 : vector<2x300xi1>, vector<2x300xf32>
    %cst_31 = arith.constant dense<0.000000e+00> : vector<2xf32>
    %77 = vector.multi_reduction <add>, %76, %cst_31 [1] : vector<2x300xf32> to vector<2xf32>
    %78 = vector.shape_cast %77 : vector<2xf32> to vector<2x1xf32>
    %79 = arith.mulf %76, %76 : vector<2x300xf32>
    %cst_32 = arith.constant dense<0.000000e+00> : vector<2xf32>
    %80 = vector.multi_reduction <add>, %79, %cst_32 [1] : vector<2x300xf32> to vector<2xf32>
    %81 = vector.shape_cast %80 : vector<2xf32> to vector<2x1xf32>
    %cst_33 = arith.constant 0.00333333341 : f32
    %82 = vector.broadcast %cst_33 : f32 to vector<2x1xf32>
    %83 = arith.mulf %78, %82 : vector<2x1xf32>
    %cst_34 = arith.constant 0.00333333341 : f32
    %84 = vector.broadcast %cst_34 : f32 to vector<2x1xf32>
    %85 = arith.mulf %81, %84 : vector<2x1xf32>
    %86 = arith.mulf %83, %83 : vector<2x1xf32>
    %87 = arith.subf %85, %86 : vector<2x1xf32>
    %88 = vector.broadcast %83 : vector<2x1xf32> to vector<2x300xf32>
    %89 = arith.subf %76, %88 : vector<2x300xf32>
    %cst_35 = arith.constant 9.99999974E-6 : f32
    %90 = vector.broadcast %cst_35 : f32 to vector<2x1xf32>
    %91 = arith.addf %87, %90 : vector<2x1xf32>
    %92 = math.rsqrt %91 : vector<2x1xf32>
    %93 = vector.broadcast %92 : vector<2x1xf32> to vector<2x300xf32>
    %94 = arith.mulf %89, %93 : vector<2x300xf32>
    %c0_36 = arith.constant 0 : index
    %c0_37 = arith.constant 0 : index
    %95 = vector.load %arg7[%c0_36, %c0_37] : memref<1x300xf32, #tpu.memory_space<vmem>>, vector<1x300xf32>
    %96 = vector.broadcast %95 : vector<1x300xf32> to vector<2x300xf32>
    %97 = arith.mulf %94, %96 : vector<2x300xf32>
    %cst_38 = arith.constant dense<0.000000e+00> : vector<2xf32>
    %98 = vector.multi_reduction <add>, %97, %cst_38 [1] : vector<2x300xf32> to vector<2xf32>
    %99 = vector.shape_cast %98 : vector<2xf32> to vector<2x1xf32>
    %c0_39 = arith.constant 0 : index
    %c0_40 = arith.constant 0 : index
    %100 = vector.load %arg8[%c0_39, %c0_40] : memref<1x1xf32, #tpu.memory_space<vmem>>, vector<1x1xf32>
    %101 = vector.broadcast %100 : vector<1x1xf32> to vector<2x1xf32>
    %102 = arith.addf %99, %101 : vector<2x1xf32>
    %c0_41 = arith.constant 0 : index
    %c0_42 = arith.constant 0 : index
    %103 = vector.load %arg9[%c0_41, %c0_42] : memref<2x1xf32, #tpu.memory_space<vmem>>, vector<2x1xf32>
    tpu.vector_store %arg9[%c0_41, %c0_42], %102 {strides = array<i32>} : memref<2x1xf32, #tpu.memory_space<vmem>>, vector<2x1xf32>,
    return
  }
}

</mosaic_0001>

<bundles_post_ra>
// kernel: q_forward.1
= control target key start
LH: loop header
LB: loop body
LE: loop exit
PB: predicated region body
PF: predicated region fallthrough
CT: control target
= control target key end

     0   :  { %s1856_s0 = inlined_call_operand.vmem [shape: f32[2,24], index: 0, kind: input, shape index: {}]   ;;  %s1857_s1 = inlined_call_operand.hbm [shape: f32[2,8], index: 1, kind: input, shape index: {}]   ;;  %s1858_s2 = inlined_call_operand.hbm [shape: bf16[24,400], index: 2, kind: input, shape index: {}]   ;;  %s1859_s3 = inlined_call_operand.vmem [shape: bf16[8,400], index: 3, kind: input, shape index: {}]   ;;  %s1860_s4 = inlined_call_operand.hbm [shape: f32[1,400], index: 4, kind: input, shape index: {}]   ;;  %s1861_s5 = inlined_call_operand.hbm [shape: bf16[400,300], index: 5, kind: input, shape index: {}]   ;;  %s1862_s6 = inlined_call_operand.hbm [shape: f32[1,300], index: 6, kind: input, shape index: {}]   ;;  %s1863_s7 = inlined_call_operand.vmem [shape: f32[1,300], index: 7, kind: input, shape index: {}]   ;;  %s1864_s8 = inlined_call_operand.<no memory space> [shape: f32[1,1], index: 8, kind: input, shape index: {}]   ;;  %s1865_s9 = inlined_call_operand.vmem [shape: f32[2,1], index: 9, kind: output, shape index: {}]  }
   0x1   :  { %v14_v0 = vstv %s1864_s8 }
   0x2   :  { %15 = vst [vmem:[#allocation2] sm:$0x1] %v14_v0 }
   0x3   :  { %16 = vsyncpa [#allocation4], 0 }
   0x4   :  { %17 = vsyncpa [#allocation6], 0 }
   0x5   :  { %18 = vsyncpa [#allocation9], 0  ;;  %s1627_s11 = smov [#allocation5]   ;;  %s1511_s15 = scalar_lea.hbm %s1858_s2, 768 }
   0x6   :  { %s36_s12 = sshll.u32 %s1627_s11, 4  ;;  %p1512_p0 = scmp.ne.s32.totalorder %s1858_s2, %s1511_s15  ;;  %s37_s12 = int_to_ptr.vmem [resolvable:$true] %s36_s12 }
   0x7   :  { %p1515_p1 = scmp.lt.u32.totalorder %s1511_s15, %s1858_s2 }
   0x9   :  { %p1517_p2 = pnand %p1515_p1, %p1512_p0 }
   0xb   :  { %1520 = shalt.err (!%p1517_p2)
}
   0xc   :  { %s1521_s8 = scalar_lea.vmem %s37_s12, 768  ;;  %p1526_p4 = scmp.lt.s32.totalorder %s37_s12, %s37_s12 }
   0xd   :  { %p1522_p3 = scmp.ne.s32.totalorder %s37_s12, %s1521_s8  ;;  %p1527_p5 = scmp.lt.s32.totalorder %s1521_s8, %s1521_s8 }
   0xf   :  { %p1528_p6 = por %p1527_p5, %p1526_p4 }
  0x11   :  { %p1529_p7 = pnand %p1528_p6, %p1522_p3 }
  0x13   :  { %1532 = shalt.err (!%p1529_p7)
}
  0x14   :  { %s1628_s20 = smov 256   ;;  %s1629_s21 = smov 16  }
  0x15   :  { %42 = dma.hbm_to_vmem [thread:$0]  %s1858_s2, 768, %s37_s12, [#allocation6], %s1628_s20, %s1628_s20, %s1629_s21  }
  0x16   :  { %s1630_s24 = smov [#allocation8]   ;;  %s1533_s28 = scalar_lea.hbm %s1861_s5, 9600 }
  0x17   :  { %s60_s25 = sshll.u32 %s1630_s24, 4  ;;  %p1534_p8 = scmp.ne.s32.totalorder %s1861_s5, %s1533_s28  ;;  %s61_s25 = int_to_ptr.vmem [resolvable:$true] %s60_s25 }
  0x18   :  { %p1537_p9 = scmp.lt.u32.totalorder %s1533_s28, %s1861_s5 }
  0x1a   :  { %p1539_p10 = pnand %p1537_p9, %p1534_p8 }
  0x1c   :  { %1542 = shalt.err (!%p1539_p10)
}
  0x1d   :  { %s1543_s13 = scalar_lea.vmem %s61_s25, 9600  ;;  %p1548_p12 = scmp.lt.s32.totalorder %s61_s25, %s61_s25 }
  0x1e   :  { %p1544_p11 = scmp.ne.s32.totalorder %s61_s25, %s1543_s13  ;;  %p1549_p13 = scmp.lt.s32.totalorder %s1543_s13, %s1543_s13 }
  0x20   :  { %p1550_p0 = por %p1549_p13, %p1548_p12 }
  0x22   :  { %p1551_p1 = pnand %p1550_p0, %p1544_p11 }
  0x24   :  { %1554 = shalt.err (!%p1551_p1)
}
  0x25   :  { %s1631_s2 = smov 192   ;;  %s1632_s12 = smov 12  }
  0x26   :  { %66 = dma.hbm_to_vmem [thread:$0]  %s1861_s5, 9600, %s61_s25, [#allocation9], %s1631_s2, %s1631_s2, %s1632_s12  }
  0x27   :  { %s1633_s16 = smov [#allocation3]   ;;  %s1634_s18 = smov [#allocation7]  }
  0x28   :  { %s27_s17 = sshll.u32 %s1633_s16, 4  ;;  %s51_s19 = sshll.u32 %s1634_s18, 4  ;;  %s28_s17 = int_to_ptr.vmem [resolvable:$true] %s27_s17  ;;  %s52_s19 = int_to_ptr.vmem [resolvable:$true] %s51_s19 }
  0x29   :  { %s1555_s21 = scalar_lea.hbm %s1857_s1, 32 }
  0x2a   :  { %p1556_p2 = scmp.ne.s32.totalorder %s1857_s1, %s1555_s21  ;;  %p1559_p3 = scmp.lt.u32.totalorder %s1555_s21, %s1857_s1 }
  0x2c   :  { %p1561_p4 = pnand %p1559_p3, %p1556_p2 }
  0x2e   :  { %1564 = shalt.err (!%p1561_p4)
}
  0x2f   :  { %s1565_s5 = scalar_lea.vmem %s28_s17, 32  ;;  %p1570_p6 = scmp.lt.s32.totalorder %s28_s17, %s28_s17 }
  0x30   :  { %p1566_p5 = scmp.ne.s32.totalorder %s28_s17, %s1565_s5  ;;  %p1571_p7 = scmp.lt.s32.totalorder %s1565_s5, %s1565_s5 }
  0x32   :  { %p1572_p8 = por %p1571_p7, %p1570_p6 }
  0x34   :  { %p1573_p9 = pnand %p1572_p8, %p1566_p5 }
  0x36   :  { %1576 = shalt.err (!%p1573_p9)
}
  0x37   :  { %30 = dma.hbm_to_vmem [thread:$0]  %s1857_s1, 32, %s28_s17, [#allocation4]  }
  0x38   :  { %s1577_s30 = scalar_lea.hbm %s1860_s4, 64 }
  0x39   :  { %p1578_p10 = scmp.ne.s32.totalorder %s1860_s4, %s1577_s30  ;;  %p1581_p11 = scmp.lt.u32.totalorder %s1577_s30, %s1860_s4 }
  0x3b   :  { %p1583_p12 = pnand %p1581_p11, %p1578_p10 }
  0x3d   :  { %1586 = shalt.err (!%p1583_p12)
}
  0x3e   :  { %s1587_s12 = scalar_lea.vmem %s52_s19, 64  ;;  %p1592_p0 = scmp.lt.s32.totalorder %s52_s19, %s52_s19 }
  0x3f   :  { %p1588_p13 = scmp.ne.s32.totalorder %s52_s19, %s1587_s12  ;;  %p1593_p1 = scmp.lt.s32.totalorder %s1587_s12, %s1587_s12 }
  0x41   :  { %p1594_p2 = por %p1593_p1, %p1592_p0 }
  0x43   :  { %p1595_p3 = pnand %p1594_p2, %p1588_p13 }
  0x45   :  { %1598 = shalt.err (!%p1595_p3)
}
  0x46   :  { %54 = dma.hbm_to_vmem [thread:$0]  %s1860_s4, 64, %s52_s19, [#allocation6]  }
  0x47   :  { %s1635_s15 = smov [#allocation10]   ;;  %s1599_s8 = scalar_lea.hbm %s1862_s6, 48 }
  0x48   :  { %s73_s16 = sshll.u32 %s1635_s15, 4  ;;  %p1600_p4 = scmp.ne.s32.totalorder %s1862_s6, %s1599_s8  ;;  %s74_s16 = int_to_ptr.vmem [resolvable:$true] %s73_s16 }
  0x49   :  { %p1603_p5 = scmp.lt.u32.totalorder %s1599_s8, %s1862_s6 }
  0x4b   :  { %p1605_p6 = pnand %p1603_p5, %p1600_p4 }
  0x4d   :  { %1608 = shalt.err (!%p1605_p6)
}
  0x4e   :  { %s1609_s24 = scalar_lea.vmem %s74_s16, 48  ;;  %s1613_s4 = scalar_lea.vmem %s74_s16, 64 }
  0x4f   :  { %p1610_p7 = scmp.ne.s32.totalorder %s74_s16, %s1609_s24  ;;  %p1614_p8 = scmp.lt.s32.totalorder %s74_s16, %s74_s16 }
  0x50   :  { %p1615_p9 = scmp.lt.s32.totalorder %s1613_s4, %s1609_s24 }
  0x52   :  { %p1616_p10 = por %p1615_p9, %p1614_p8 }
  0x54   :  { %p1617_p11 = pnand %p1616_p10, %p1610_p7 }
  0x56   :  { %1620 = shalt.err (!%p1617_p11)
}
  0x57   :  { %76 = dma.hbm_to_vmem [thread:$0]  %s1862_s6, 48, %s74_s16, [#allocation9]  }
  0x58   :  { %1621 = dma.done.wait [#allocation4], 32  }
  0x59   :  { %1622 = vsyncadd [#allocation4], 4294967264 }
  0x5a   :  { %1623 = dma.done.wait [#allocation6], 832  }
  0x5b   :  { %1624 = vsyncadd [#allocation6], 4294966464 }
  0x5c   :  { %1625 = dma.done.wait [#allocation9], 9648  }
  0x5d   :  { %1626 = vsyncadd [#allocation9], 4294957648  ;;  %vm99_vm0 = vcmask 189440   ;;  %v97_v1 = vld [vmem:[%s1856_s0] sm:$0x3]  ;;  %vm103_vm1 = vcmask 58368  }
  0x5e   :  { %v98_v2 = vld [vmem:[#allocation3] sm:$0x3]  ;;  %v100_v3 = vsel %vm99_vm0, %v97_v1, 0.0  ;;  %v108_v4 = vmul.f32 %v97_v1, %v97_v1  ;;  %vm151_vm2 = vcmask 1043456   ;;  %v136_v10 = vld [vmem:[%s1859_s3 + $0x8] sm:$0xff]  ;;  %v1636_v13 = vmov 0  }
  0x5f   :  { %v112_v5 = vmul.f32 %v98_v2, %v98_v2  ;;  %101 = vadd.xlane.f32.xlu0 %v100_v3  ;;  %v104_v7 = vsel %vm103_vm1, %v98_v2, 0.0  ;;  %v135_v9 = vld [vmem:[%s1859_s3] sm:$0xff]  ;;  %196 = vmatprep.mubr.bf16.mxu1 %v1636_v13  ;;  %v1237_v14 = vcombine.high %v136_v10, %v136_v10  ;;  %v1236_v28 = vcombine.low %v136_v10, %v136_v10  ;;  %v133_v42 = vld [vmem:[#allocation5 + $0x28] sm:$0xff] }
  0x60   :  { %v109_v6 = vsel %vm99_vm0, %v108_v4, 0.0  ;;  %v1235_v11 = vcombine.high %v135_v9, %v135_v9  ;;  %v1234_v12 = vcombine.low %v135_v9, %v135_v9  ;;  %vm147_vm3 = vcmask 64512   ;;  %v1383_v33 = vld [vmem:[#allocation5 + $0x4] ss:$16 sps:$4 sm:$0xff]   ;;  %v1381_v35 = vld [vmem:[#allocation5] ss:$16 sps:$4 sm:$0xff]  }
  0x61   :  { %110 = vadd.xlane.f32.xlu1 %v109_v6  ;;  %v113_v8 = vsel %vm103_vm1, %v112_v5, 0.0  ;;  %v159_v32 = vsel %vm151_vm2, %v1236_v28, 0  ;;  %v132_v34 = vld [vmem:[#allocation5 + $0x20] sm:$0xff]  ;;  %v1388_v40 = vld [vmem:[#allocation5 + $0xc] ss:$16 sps:$4 sm:$0xff]   ;;  %vm276_vm4 = vcmask 195584   ;;  %v1249_v45 = vcombine.high %v133_v42, %v133_v42 }
  0x62   :  { %1238 = vmatprep.subr.msk.bf16.mxu1 %vm151_vm2, %v1235_v11  ;;  %v153_v15 = vsel %vm151_vm2, %v1234_v12, 0  ;;  %v1247_v36 = vcombine.high %v132_v34, %v132_v34  ;;  %v1246_v37 = vcombine.low %v132_v34, %v132_v34  ;;  %v1386_v43 = vld [vmem:[#allocation5 + $0x8] ss:$16 sps:$4 sm:$0xff]   ;;  %v1248_v46 = vcombine.low %v133_v42, %v133_v42  ;;  %v1393_v49 = vld [vmem:[#allocation8] ss:$12 sps:$4 sm:$0xff]  }
  0x63   :  { %105 = vadd.xlane.f32.xlu0 %v104_v7  ;;  %165 = vmatpush1.bf16.msra.mxu1 %v153_v15  ;;  %v1391_v48 = vld [vmem:[#allocation8 + $0x4] ss:$12 sps:$4 sm:$0xff]   ;;  %v1394_v50 = vld [vmem:[#allocation8 + $0x1c] ss:$12 sps:$4 sm:$0xff]   ;;  %v1397_v52 = vld [vmem:[#allocation8 + $0x34] ss:$12 sps:$4 sm:$0xff]   ;;  %v376_v15 = vlaneseq }
  0x64   :  { %1240 = vmatprep.subr.msk.bf16.mxu1 %vm151_vm2, %v1237_v14  ;;  %v281_v39 = vsel %vm151_vm2, %v1246_v37, 0  ;;  %v287_v47 = vsel %vm151_vm2, %v1248_v46, 0  ;;  %983 = vmatprep.subr.bf16.mxu0 %v1391_v48  ;;  %v1396_v51 = vld [vmem:[#allocation8 + $0x18] ss:$12 sps:$4 sm:$0xff]   ;;  %v1417_v53 = vld [vmem:[#allocation8 + $0xc8] ss:$12 sps:$4 sm:$0xff]  }
  0x65   :  { %114 = vadd.xlane.f32.xlu1 %v113_v8  ;;  %984 = vmatpush1.bf16.msra.mxu0 %v1393_v49  ;;  %v1419_v54 = vld [vmem:[#allocation8 + $0x8] ss:$12 sps:$4 sm:$0xff]   ;;  %v1399_v55 = vld [vmem:[#allocation8 + $0x30] ss:$12 sps:$4 sm:$0xff]   ;;  %v1422_v56 = vld [vmem:[#allocation8 + $0xe0] ss:$12 sps:$4 sm:$0xff]  }
  0x66   :  { %985 = vmatprep.subr.bf16.mxu0 %v1394_v50  ;;  %v1400_v57 = vld [vmem:[#allocation8 + $0x4c] ss:$12 sps:$4 sm:$0xff]   ;;  %v1402_v60 = vld [vmem:[#allocation8 + $0x48] ss:$12 sps:$4 sm:$0xff]   ;;  %v1403_v61 = vld [vmem:[#allocation8 + $0x64] ss:$12 sps:$4 sm:$0xff]  }
  0x67   :  { %v1424_v58 = vld [vmem:[#allocation8 + $0x20] ss:$12 sps:$4 sm:$0xff]   ;;  %v1427_v59 = vld [vmem:[#allocation8 + $0xf8] ss:$12 sps:$4 sm:$0xff]   ;;  %v1406_v63 = vld [vmem:[#allocation8 + $0x7c] ss:$12 sps:$4 sm:$0xff]  }
  0x68   :  { %v1405_v62 = vld [vmem:[#allocation8 + $0x60] ss:$12 sps:$4 sm:$0xff]   ;;  %v1408_v0 = vld [vmem:[#allocation8 + $0x78] ss:$12 sps:$4 sm:$0xff]   ;;  %v1414_v4 = vld [vmem:[#allocation8 + $0xa8] ss:$12 sps:$4 sm:$0xff]  }
  0x69   :  { %986 = vmatpush1.bf16.msra.mxu0 %v1396_v51  ;;  %v1412_v3 = vld [vmem:[#allocation8 + $0xac] ss:$12 sps:$4 sm:$0xff]   ;;  %v1415_v5 = vld [vmem:[#allocation8 + $0xc4] ss:$12 sps:$4 sm:$0xff]   ;;  %v1420_v7 = vld [vmem:[#allocation8 + $0xdc] ss:$12 sps:$4 sm:$0xff]  }
  0x6a   :  { %987 = vmatprep.subr.bf16.mxu0 %v1397_v52  ;;  %v1418_v6 = vld [vmem:[#allocation8 + $0xc0] ss:$12 sps:$4 sm:$0xff]   ;;  %v1423_v8 = vld [vmem:[#allocation8 + $0xd8] ss:$12 sps:$4 sm:$0xff]   ;;  %vm420_vm7 = vcmask 1041408   ;;  %vm426_vm8 = vcmask 123904  }
  0x6b   :  { %v1425_v9 = vld [vmem:[#allocation8 + $0xf4] ss:$12 sps:$4 sm:$0xff]   ;;  %vm979_vm11 = vcmask 130048   ;;  %vm1163_vm15 = vcmask 353280   ;;  %vm1225_vm0 = vcmask 1024  }
  0x6d   :  { %988 = vmatpush1.bf16.msra.mxu0 %v1399_v55 }
  0x6e   :  { %989 = vmatprep.subr.bf16.mxu0 %v1400_v57 }
  0x71   :  { %990 = vmatpush1.bf16.msra.mxu0 %v1402_v60 }
  0x72   :  { %991 = vmatprep.subr.bf16.mxu0 %v1403_v61 }
  0x75   :  { %992 = vmatpush1.bf16.msra.mxu0 %v1405_v62 }
  0x76   :  { %993 = vmatprep.subr.bf16.mxu0 %v1406_v63 }
  0x79   :  { %994 = vmatpush1.bf16.msra.mxu0 %v1408_v0 }
  0xec   :  { %v102_v16 = vpop.xlane.xlu0 %101 }
  0xee   :  { %v111_v17 = vpop.xlane.xlu1 %110 }
  0xf0   :  { %v106_v18 = vpop.xlane.xlu0 %105 }
  0xf1   :  { %v107_v19 = vadd.f32 %v106_v18, %v102_v16  ;;  %v377_v16 = vshrl.u32 %v376_v15, 7 }
  0xf2   :  { %v115_v20 = vpop.xlane.xlu1 %114 }
  0xf3   :  { %v117_v21 = vmul.f32 0.03125, %v107_v19  ;;  %v116_v22 = vadd.f32 %v115_v20, %v111_v17 }
  0xf5   :  { %v118_v23 = vmul.f32 0.03125, %v116_v22  ;;  %v119_v24 = vmul.f32 %v117_v21, %v117_v21  ;;  %v125_v27 = vsub.f32 %v98_v2, %v117_v21  ;;  %v123_v38 = vsub.f32 %v97_v1, %v117_v21  ;;  %v1409_v1 = vld [vmem:[#allocation8 + $0x94] ss:$12 sps:$4 sm:$0xff]   ;;  %v1411_v2 = vld [vmem:[#allocation8 + $0x90] ss:$12 sps:$4 sm:$0xff]  }
  0xf6   :  { %995 = vmatprep.subr.bf16.mxu0 %v1409_v1  ;;  %v1771_v21 = vsub.s32 0, %v377_v16  ;;  %v374_v22 = vld [vmem:[#allocation7] sm:$0xf] }
  0xf7   :  { %v120_v25 = vsub.f32 %v118_v23, %v119_v24  ;;  %996 = vmatpush1.bf16.msra.mxu0 %v1411_v2  ;;  %v1773_v23 = vsub.s32 1, %v377_v16 }
  0xf8   :  { %997 = vmatprep.subr.bf16.mxu0 %v1412_v3  ;;  %v379_v24 = vrot.slane %v374_v22, %v1771_v21 }
  0xf9   :  { %v121_v26 = vadd.f32 1e-05, %v120_v25 }
  0xfb   :  { %1491 = vrsqrt.f32 %v121_v26  ;;  %998 = vmatpush1.bf16.msra.mxu0 %v1414_v4  ;;  %v383_v26 = vrot.slane %v374_v22, %v1773_v23 }
  0xfc   :  { %999 = vmatprep.subr.bf16.mxu0 %v1415_v5 }
  0xff   :  { %1000 = vmatpush1.bf16.msra.mxu0 %v1418_v6 }
 0x100   :  { %1001 = vmatprep.subr.bf16.mxu0 %v1420_v7 }
 0x103   :  { %1002 = vmatpush1.bf16.msra.mxu0 %v1423_v8 }
 0x104   :  { %1003 = vmatprep.subr.bf16.mxu0 %v1425_v9 }
 0x105   :  { %v1492_v29 = vpop.eup %1491 }
 0x106   :  { %v126_v30 = vmul.f32 %v1492_v29, %v125_v27  ;;  %v124_v41 = vmul.f32 %v1492_v29, %v123_v38 }
 0x108   :  { %v134_v31 = vpack.c.bf16 %v126_v30, %v126_v30  ;;  %v127_v44 = vpack.c.bf16 %v124_v41, %v124_v41 }
 0x10a   :  { %1239 = vmatmul.mubr.msk.bf16.vlgmr.msra.gmra.mrb[0].mxu1 %vm147_vm3, %v134_v31 }
 0x10b   :  { %206 = vmatpush1.bf16.msra.mxu1 %v159_v32  ;;  %237 = vmatprep.mubr.bf16.mxu1 %v1636_v13 }
 0x10c   :  { %292 = vmatprep.subr.bf16.mxu1 %v1383_v33  ;;  %v1777_v33 = vsub.s32 2, %v377_v16 }
 0x10e   :  { %v387_v38 = vrot.slane %v374_v22, %v1777_v33 }
 0x112   :  { %1241 = vmatmul.mubr.msk.bf16.vlgmr.msra.gmra.mrb[4].mxu1 %vm147_vm3, %v134_v31 }
 0x113   :  { %293 = vmatpush1.bf16.msra.mxu1 %v1381_v35  ;;  %324 = vmatprep.mubr.bf16.mxu1 %v1636_v13  ;;  %v390_v35 = vsub.s32 3, %v377_v16 }
 0x114   :  { %1250 = vmatprep.subr.msk.bf16.mxu1 %vm151_vm2, %v1247_v36 }
 0x117   :  { %295 = vmatpush1.bf16.msra.mxu1 %v281_v39 }
 0x118   :  { %333 = vmatprep.subr.bf16.mxu1 %v1388_v40  ;;  %v391_v40 = vrot.slane %v374_v22, %v390_v35  ;;  %v1433_v22 = vld [vmem:[#allocation8 + $0x108] ss:$12 sps:$4 sm:$0xff]   ;;  %v1447_v35 = vld [vmem:[#allocation8 + $0x158] ss:$12 sps:$4 sm:$0xff]  }
 0x11a   :  { %1251 = vmatmul.mubr.msk.bf16.vlgmr.msra.gmra.mrb[8].mxu1 %vm276_vm4, %v127_v44 }
 0x11b   :  { %334 = vmatpush1.bf16.msra.mxu1 %v1386_v43  ;;  %365 = vmatprep.mubr.bf16.mxu1 %v1636_v13 }
 0x11c   :  { %1252 = vmatprep.subr.msk.bf16.mxu1 %vm151_vm2, %v1249_v45 }
 0x11f   :  { %336 = vmatpush1.bf16.msra.mxu1 %v287_v47 }
 0x120   :  { %1339 = vmatprep.subr.bf16.mxu1 %v1417_v53 }
 0x122   :  { %1253 = vmatmul.mubr.msk.bf16.vlgmr.msra.gmra.mrb[12].mxu1 %vm276_vm4, %v127_v44 }
 0x123   :  { %1340 = vmatpush3.bf16.msra.mxu1 %v1419_v54 }
 0x124   :  { %1341 = vmatprep.subr.bf16.mxu1 %v1422_v56 }
 0x127   :  { %1342 = vmatpush3.bf16.msra.mxu1 %v1424_v58 }
 0x128   :  { %1343 = vmatprep.subr.bf16.mxu1 %v1427_v59 }
 0x1dd   :  { %v198_v10 = vpop.f32.mrb[0].mxu1 }
 0x1de   :  { %v200_v11 = vpop.f32.mrb[1].mxu1 }
 0x1df   :  { %v202_v12 = vpop.f32.mrb[2].mxu1 }
 0x1e0   :  { %v203_v14 = vpop.f32.mrb[3].mxu1 }
 0x1e5   :  { %v239_v17 = vpop.f32.mrb[4].mxu1 }
 0x1e6   :  { %v241_v18 = vpop.f32.mrb[5].mxu1 }
 0x1e7   :  { %v243_v19 = vpop.f32.mrb[6].mxu1 }
 0x1e8   :  { %v244_v20 = vpop.f32.mrb[7].mxu1  ;;  %v1430_v19 = vld [vmem:[#allocation8 + $0x10c] ss:$12 sps:$4 sm:$0xff]  }
 0x1e9   :  { %v1432_v20 = vld [vmem:[#allocation8 + $0x110] ss:$12 sps:$4 sm:$0xff]  }
 0x1ed   :  { %v326_v25 = vpop.f32.mrb[8].mxu1 }
 0x1ee   :  { %v327_v27 = vadd.f32 %v326_v25, %v198_v10  ;;  %v328_v28 = vpop.f32.mrb[9].mxu1  ;;  %v1435_v25 = vld [vmem:[#allocation8 + $0x124] ss:$12 sps:$4 sm:$0xff]  }
 0x1ef   :  { %v329_v29 = vadd.f32 %v328_v28, %v200_v11  ;;  %v330_v30 = vpop.f32.mrb[10].mxu1  ;;  %v1439_v28 = vld [vmem:[#allocation8 + $0x68] ss:$12 sps:$4 sm:$0xff]  }
 0x1f0   :  { %v396_v31 = vadd.f32 %v379_v24, %v327_v27  ;;  %v331_v32 = vpop.f32.mrb[11].mxu1  ;;  %v1434_v24 = vld [vmem:[#allocation8 + $0x50] ss:$12 sps:$4 sm:$0xff]   ;;  %v1438_v27 = vld [vmem:[#allocation8 + $0x120] ss:$12 sps:$4 sm:$0xff]  }
 0x1f1   :  { %v397_v34 = vadd.f32 %v383_v26, %v329_v29  ;;  %v1437_v26 = vld [vmem:[#allocation8 + $0x128] ss:$12 sps:$4 sm:$0xff]   ;;  %v1442_v30 = vld [vmem:[#allocation8 + $0x140] ss:$12 sps:$4 sm:$0xff]  }
 0x1f2   :  { %v404_v36 = vmul.f32 1.442695, %v396_v31  ;;  %vm400_vm5 = vcmp.gt.f32.partialorder %v396_v31, 0.0  ;;  %v1440_v29 = vld [vmem:[#allocation8 + $0x13c] ss:$12 sps:$4 sm:$0xff]  }
 0x1f3   :  { %v406_v37 = vmul.f32 1.442695, %v397_v34  ;;  %vm401_vm6 = vcmp.gt.f32.partialorder %v397_v34, 0.0  ;;  %v1444_v32 = vld [vmem:[#allocation8 + $0x80] ss:$12 sps:$4 sm:$0xff]  }
 0x1f4   :  { %1493 = vpow2.f32 %v404_v36  ;;  %v1448_v36 = vld [vmem:[#allocation8 + $0x150] ss:$12 sps:$4 sm:$0xff]  }
 0x1f5   :  { %1495 = vpow2.f32 %v406_v37  ;;  %v367_v39 = vpop.f32.mrb[12].mxu1  ;;  %v1449_v37 = vld [vmem:[#allocation8 + $0x98] ss:$12 sps:$4 sm:$0xff]  }
 0x1f6   :  { %v368_v41 = vadd.f32 %v367_v39, %v239_v17  ;;  %v369_v42 = vpop.f32.mrb[13].mxu1  ;;  %v1428_v17 = vld [vmem:[#allocation8 + $0xf0] ss:$12 sps:$4 sm:$0xff]  }
 0x1f7   :  { %v370_v43 = vadd.f32 %v369_v42, %v241_v18  ;;  %v371_v44 = vpop.f32.mrb[14].mxu1  ;;  %v1429_v18 = vld [vmem:[#allocation8 + $0x38] ss:$12 sps:$4 sm:$0xff]   ;;  %1004 = vmatpush1.bf16.msra.mxu0 %v1428_v17  ;;  %v1452_v39 = vld [vmem:[#allocation8 + $0x170] ss:$12 sps:$4 sm:$0xff]  }
 0x1f8   :  { %v398_v45 = vadd.f32 %v387_v38, %v368_v41  ;;  %v372_v46 = vpop.f32.mrb[15].mxu1  ;;  %1344 = vmatpush3.bf16.msra.mxu1 %v1429_v18  ;;  %1005 = vmatprep.subr.bf16.mxu0 %v1430_v19  ;;  %v1450_v38 = vld [vmem:[#allocation8 + $0x16c] ss:$12 sps:$4 sm:$0xff]   ;;  %v1454_v41 = vld [vmem:[#allocation8 + $0xb0] ss:$12 sps:$4 sm:$0xff]  }
 0x1f9   :  { %v399_v47 = vadd.f32 %v391_v40, %v370_v43  ;;  %1345 = vmatprep.subr.bf16.mxu1 %v1432_v20  ;;  %v1453_v40 = vld [vmem:[#allocation8 + $0x168] ss:$12 sps:$4 sm:$0xff]   ;;  %v1457_v42 = vld [vmem:[#allocation8 + $0x184] ss:$12 sps:$4 sm:$0xff]   ;;  %v1485_v18 = vld [vmem:[#allocation8 + $0x22c] ss:$12 sps:$4 sm:$0xff]  }
 0x1fa   :  { %v408_v48 = vmul.f32 1.442695, %v398_v45  ;;  %vm402_vm9 = vcmp.gt.f32.partialorder %v398_v45, 0.0  ;;  %v1482_v17 = vld [vmem:[#allocation8 + $0x218] ss:$12 sps:$4 sm:$0xff]  }
 0x1fb   :  { %v410_v49 = vmul.f32 1.442695, %v399_v47  ;;  %vm403_vm10 = vcmp.gt.f32.partialorder %v399_v47, 0.0  ;;  %1006 = vmatpush1.bf16.msra.mxu0 %v1433_v22  ;;  %v1483_v19 = vld [vmem:[#allocation8 + $0x228] ss:$12 sps:$4 sm:$0xff]  }
 0x1fc   :  { %1497 = vpow2.f32 %v408_v48  ;;  %1346 = vmatpush3.bf16.msra.mxu1 %v1434_v24  ;;  %1007 = vmatprep.subr.bf16.mxu0 %v1435_v25  ;;  %v1486_v20 = vld [vmem:[#allocation8 + $0x230] ss:$12 sps:$4 sm:$0xff]   ;;  %v1487_v25 = vld [vmem:[#allocation8 + $0x240] ss:$12 sps:$4 sm:$0xff]  }
 0x1fd   :  { %1499 = vpow2.f32 %v410_v49  ;;  %1347 = vmatprep.subr.bf16.mxu1 %v1437_v26  ;;  %v1489_v22 = vld [vmem:[#allocation8 + $0x244] ss:$12 sps:$4 sm:$0xff]   ;;  %v1490_v26 = vld [vmem:[#allocation8 + $0x248] ss:$12 sps:$4 sm:$0xff]  }
 0x1fe   :  { %v1494_v50 = vpop.eup %1493 }
 0x1ff   :  { %v1496_v51 = vpop.eup %1495  ;;  %v1254_v52 = vadd.f32 -1.0, %v1494_v50  ;;  %1008 = vmatpush1.bf16.msra.mxu0 %v1438_v27 }
 0x200   :  { %v1255_v53 = vadd.f32 -1.0, %v1496_v51  ;;  %1348 = vmatpush3.bf16.msra.mxu1 %v1439_v28  ;;  %1009 = vmatprep.subr.bf16.mxu0 %v1440_v29 }
 0x201   :  { %v1780_v54 = vsel %vm400_vm5, %v396_v31, %v1254_v52  ;;  %v1443_v31 = vld [vmem:[#allocation8 + $0x138] ss:$12 sps:$4 sm:$0xff]   ;;  %1349 = vmatprep.subr.bf16.mxu1 %v1442_v30 }
 0x202   :  { %v1782_v55 = vsel %vm401_vm6, %v397_v34, %v1255_v53  ;;  %v431_v56 = vmul.f32 %v1780_v54, %v1780_v54  ;;  %v421_v59 = vsel %vm420_vm7, %v1780_v54, 0.0  ;;  %v1445_v34 = vld [vmem:[#allocation8 + $0x154] ss:$12 sps:$4 sm:$0xff]  }
 0x203   :  { %v432_v57 = vmul.f32 %v1782_v55, %v1782_v55  ;;  %v422_v60 = vsel %vm420_vm7, %v1782_v55, 0.0  ;;  %1010 = vmatpush1.bf16.msra.mxu0 %v1443_v31 }
 0x204   :  { %v435_v0 = vsel %vm420_vm7, %v431_v56, 0.0  ;;  %v423_v3 = vadd.f32 %v422_v60, %v421_v59  ;;  %1350 = vmatpush3.bf16.msra.mxu1 %v1444_v32  ;;  %1011 = vmatprep.subr.bf16.mxu0 %v1445_v34  ;;  %v1455_v60 = vld [vmem:[#allocation8 + $0x180] ss:$12 sps:$4 sm:$0xff]  }
 0x205   :  { %v436_v1 = vsel %vm420_vm7, %v432_v57, 0.0  ;;  %1351 = vmatprep.subr.bf16.mxu1 %v1447_v35 }
 0x206   :  { %v1498_v58 = vpop.eup %1497  ;;  %v437_v10 = vadd.f32 %v436_v1, %v435_v0  ;;  %v1462_v0 = vld [vmem:[#allocation8 + $0x1a0] ss:$12 sps:$4 sm:$0xff]  }
 0x207   :  { %v1500_v61 = vpop.eup %1499  ;;  %v1256_v62 = vadd.f32 -1.0, %v1498_v58  ;;  %1012 = vmatpush1.bf16.msra.mxu0 %v1448_v36  ;;  %v1465_v1 = vld [vmem:[#allocation8 + $0x1b4] ss:$12 sps:$4 sm:$0xff]  }
 0x208   :  { %v1257_v63 = vadd.f32 -1.0, %v1500_v61  ;;  %1352 = vmatpush3.bf16.msra.mxu1 %v1449_v37  ;;  %1013 = vmatprep.subr.bf16.mxu0 %v1450_v38 }
 0x209   :  { %v1794_v2 = vsel %vm402_vm9, %v398_v45, %v1256_v62  ;;  %1353 = vmatprep.subr.bf16.mxu1 %v1452_v39  ;;  %v1458_v62 = vld [vmem:[#allocation8 + $0x188] ss:$12 sps:$4 sm:$0xff]  }
 0x20a   :  { %v1796_v4 = vsel %vm403_vm10, %v399_v47, %v1257_v63  ;;  %v424_v5 = vsel %vm420_vm7, %v1794_v2, 0.0  ;;  %v433_v6 = vmul.f32 %v1794_v2, %v1794_v2  ;;  %v1459_v63 = vld [vmem:[#allocation8 + $0x198] ss:$12 sps:$4 sm:$0xff]  }
 0x20b   :  { %v425_v7 = vadd.f32 %v424_v5, %v423_v3  ;;  %v427_v8 = vsel %vm426_vm8, %v1796_v4, 0.0  ;;  %v434_v9 = vmul.f32 %v1796_v4, %v1796_v4  ;;  %1014 = vmatpush1.bf16.msra.mxu0 %v1453_v40  ;;  %v1463_v3 = vld [vmem:[#allocation8 + $0x1b0] ss:$12 sps:$4 sm:$0xff]   ;;  %v1469_v5 = vld [vmem:[#allocation8 + $0x1cc] ss:$12 sps:$4 sm:$0xff]  }
 0x20c   :  { %v438_v11 = vsel %vm420_vm7, %v433_v6, 0.0  ;;  %1354 = vmatpush3.bf16.msra.mxu1 %v1454_v41  ;;  %1024 = vmatprep.subr.bf16.mxu0 %v1457_v42  ;;  %v1467_v6 = vld [vmem:[#allocation8 + $0x1c8] ss:$12 sps:$4 sm:$0xff]  }
 0x20d   :  { %v428_v12 = vadd.f32 %v427_v8, %v425_v7  ;;  %v439_v14 = vadd.f32 %v438_v11, %v437_v10  ;;  %v440_v15 = vsel %vm426_vm8, %v434_v9, 0.0  ;;  %1105 = vmatprep.subr.bf16.mxu1 %v1636_v13  ;;  %v1470_v7 = vld [vmem:[#allocation8 + $0x1d0] ss:$12 sps:$4 sm:$0xff]   ;;  %v1471_v9 = vld [vmem:[#allocation8 + $0x1e0] ss:$12 sps:$4 sm:$0xff]  }
 0x20e   :  { %v1473_v8 = vld [vmem:[#allocation8 + $0x1e4] ss:$12 sps:$4 sm:$0xff]   ;;  %v1474_v10 = vld [vmem:[#allocation8 + $0x1e8] ss:$12 sps:$4 sm:$0xff]  }
 0x20f   :  { %429 = vadd.xlane.f32.xlu0 %v428_v12  ;;  %v441_v16 = vadd.f32 %v440_v15, %v439_v14  ;;  %v1477_v11 = vld [vmem:[#allocation8 + $0x1fc] ss:$12 sps:$4 sm:$0xff]   ;;  %v1475_v12 = vld [vmem:[#allocation8 + $0x1f8] ss:$12 sps:$4 sm:$0xff]   ;;  %v1478_v14 = vld [vmem:[#allocation8 + $0x200] ss:$12 sps:$4 sm:$0xff]  }
 0x210   :  { %v1481_v15 = vld [vmem:[#allocation8 + $0x214] ss:$12 sps:$4 sm:$0xff]  }
 0x211   :  { %442 = vadd.xlane.f32.xlu1 %v441_v16  ;;  %v1479_v16 = vld [vmem:[#allocation8 + $0x210] ss:$12 sps:$4 sm:$0xff]  }
 0x29c   :  { %v430_v43 = vpop.xlane.xlu0 %429 }
 0x29d   :  { %v1809_v44 = vmul.f32 0.0025, %v430_v43 }
 0x29e   :  { %v443_v45 = vpop.xlane.xlu1 %442 }
 0x29f   :  { %v445_v46 = vmul.f32 0.0025, %v443_v45  ;;  %v446_v47 = vmul.f32 %v1809_v44, %v1809_v44  ;;  %v449_v50 = vsub.f32 %v1782_v55, %v1809_v44  ;;  %v448_v51 = vsub.f32 %v1780_v54, %v1809_v44  ;;  %v1461_v55 = vld [vmem:[#allocation8 + $0x19c] ss:$12 sps:$4 sm:$0xff]  }
 0x2a0   :  { %v451_v53 = vsub.f32 %v1796_v4, %v1809_v44  ;;  %v1466_v4 = vld [vmem:[#allocation8 + $0x1b8] ss:$12 sps:$4 sm:$0xff]   ;;  %v450_v24 = vsub.f32 %v1794_v2, %v1809_v44 }
 0x2a1   :  { %v447_v48 = vsub.f32 %v445_v46, %v446_v47  ;;  %v562_v2 = vld [vmem:[#allocation10] sm:$0x7] }
 0x2a2   :  { %v575_v35 = vrot.slane %v562_v2, %v1777_v33  ;;  %v567_v36 = vrot.slane %v562_v2, %v1771_v21  ;;  %v571_v37 = vrot.slane %v562_v2, %v1773_v23 }
 0x2a3   :  { %v452_v49 = vadd.f32 1e-05, %v447_v48 }
 0x2a5   :  { %1501 = vrsqrt.f32 %v452_v49 }
 0x2af   :  { %v1817_v52 = vpop.eup %1501 }
 0x2b0   :  { %v455_v56 = vmul.f32 %v1817_v52, %v449_v50  ;;  %v454_v57 = vmul.f32 %v1817_v52, %v448_v51  ;;  %v457_v58 = vmul.f32 %v1817_v52, %v451_v53  ;;  %v456_v27 = vmul.f32 %v1817_v52, %v450_v24 }
 0x2b2   :  { %v459_v59 = vpack.c.bf16 %v455_v56, %v455_v56  ;;  %v458_v61 = vpack.c.bf16 %v454_v57, %v454_v57  ;;  %v461_v54 = vpack.c.bf16 %v457_v58, %v457_v58  ;;  %v460_v28 = vpack.c.bf16 %v456_v27, %v456_v27 }
 0x2b4   :  { %1015 = vmatprep.mubr.bf16.mxu0 %v459_v59  ;;  %1097 = vmatprep.mubr.bf16.mxu1 %v459_v59 }
 0x2b5   :  { %1016 = vmatmul.mubr.bf16.vlgmr.msra.gmra.mrb[0].mxu0 %v458_v61  ;;  %1098 = vmatmul.mubr.bf16.vlgmr.msra.gmra.mrb[16].mxu1 %v458_v61 }
 0x2b6   :  { %1025 = vmatpush1.bf16.msra.mxu0 %v1455_v60  ;;  %1106 = vmatpush1.bf16.msra.mxu1 %v1458_v62 }
 0x2b7   :  { %1333 = vmatprep.mubr.msk.bf16.mxu0 %vm979_vm11, %v461_v54  ;;  %1334 = vmatprep.mubr.msk.bf16.mxu1 %vm979_vm11, %v461_v54 }
 0x2b8   :  { %1026 = vmatprep.subr.bf16.mxu0 %v1461_v55  ;;  %1107 = vmatprep.subr.bf16.mxu1 %v1636_v13 }
 0x2ba   :  { %1027 = vmatpush1.bf16.msra.mxu0 %v1459_v63  ;;  %1108 = vmatpush1.bf16.msra.mxu1 %v1462_v0 }
 0x2bb   :  { %1028 = vmatprep.subr.bf16.mxu0 %v1465_v1  ;;  %1109 = vmatprep.subr.bf16.mxu1 %v1636_v13 }
 0x2be   :  { %1029 = vmatpush1.bf16.msra.mxu0 %v1463_v3  ;;  %1110 = vmatpush1.bf16.msra.mxu1 %v1466_v4 }
 0x2bf   :  { %1030 = vmatprep.subr.bf16.mxu0 %v1469_v5  ;;  %1111 = vmatprep.subr.bf16.mxu1 %v1636_v13 }
 0x2c2   :  { %1031 = vmatpush1.bf16.msra.mxu0 %v1467_v6  ;;  %1112 = vmatpush1.bf16.msra.mxu1 %v1470_v7 }
 0x2c3   :  { %1032 = vmatprep.subr.bf16.mxu0 %v1473_v8  ;;  %1113 = vmatprep.subr.bf16.mxu1 %v1636_v13 }
 0x2c6   :  { %1033 = vmatpush1.bf16.msra.mxu0 %v1471_v9  ;;  %1114 = vmatpush1.bf16.msra.mxu1 %v1474_v10 }
 0x2c7   :  { %1034 = vmatprep.subr.bf16.mxu0 %v1477_v11  ;;  %1115 = vmatprep.subr.bf16.mxu1 %v1636_v13 }
 0x2ca   :  { %1035 = vmatpush1.bf16.msra.mxu0 %v1475_v12  ;;  %1116 = vmatpush1.bf16.msra.mxu1 %v1478_v14 }
 0x2cb   :  { %1036 = vmatprep.subr.bf16.mxu0 %v1481_v15  ;;  %1117 = vmatprep.subr.bf16.mxu1 %v1636_v13 }
 0x2ce   :  { %1037 = vmatpush1.bf16.msra.mxu0 %v1479_v16  ;;  %1118 = vmatpush1.bf16.msra.mxu1 %v1482_v17 }
 0x2cf   :  { %1038 = vmatprep.subr.bf16.mxu0 %v1485_v18  ;;  %1119 = vmatprep.subr.bf16.mxu1 %v1636_v13 }
 0x2d2   :  { %1039 = vmatpush1.bf16.msra.mxu0 %v1483_v19  ;;  %1120 = vmatpush1.bf16.msra.mxu1 %v1486_v20  ;;  %v1190_v19 = vld [vmem:[%s1863_s7] sm:$0x7] }
 0x2d3   :  { %1040 = vmatprep.subr.bf16.mxu0 %v1489_v22  ;;  %1121 = vmatprep.subr.bf16.mxu1 %v1636_v13  ;;  %v1195_v20 = vrot.slane %v1190_v19, %v1771_v21  ;;  %v1199_v22 = vrot.slane %v1190_v19, %v1773_v23  ;;  %v1203_v27 = vrot.slane %v1190_v19, %v1777_v33 }
 0x2d6   :  { %1041 = vmatpush1.bf16.msra.mxu0 %v1487_v25  ;;  %1122 = vmatpush1.bf16.msra.mxu1 %v1490_v26 }
 0x2d9   :  { %1057 = vmatmul.mubr.bf16.vlgmr.msra.gmra.mrb[0].mxu0 %v460_v28  ;;  %1138 = vmatmul.mubr.bf16.vlgmr.msra.gmra.mrb[20].mxu1 %v460_v28 }
 0x388   :  { %v1355_v29 = vpop.f32.mrb[16].mxu1 }
 0x389   :  { %v1356_v30 = vpop.f32.mrb[17].mxu1 }
 0x38a   :  { %v1357_v31 = vadd.f32 %v1356_v30, %v1355_v29  ;;  %v1358_v32 = vpop.f32.mrb[18].mxu1 }
 0x38b   :  { %v1359_v34 = vpop.f32.mrb[19].mxu1 }
 0x38c   :  { %v1100_v13 = vadd.f32 %v1357_v31, %v575_v35 }
 0x3ac   :  { %v1058_v38 = vpop.f32.mrb[0].mxu0  ;;  %v1139_v39 = vpop.f32.mrb[20].mxu1 }
 0x3ad   :  { %v1361_v40 = vadd.f32 %v1058_v38, %v567_v36  ;;  %v1140_v41 = vadd.f32 %v1139_v39, %v1100_v13  ;;  %v1060_v42 = vpop.f32.mrb[1].mxu0  ;;  %v1141_v43 = vpop.f32.mrb[21].mxu1  ;;  %v1338_v13 = vld [vmem:[#allocation2] ss:$0 sm:$0xff] }
 0x3ae   :  { %v1362_v44 = vadd.f32 %v1060_v42, %v571_v37  ;;  %v1062_v45 = vpop.f32.mrb[2].mxu0  ;;  %v1142_v46 = vpop.f32.mrb[22].mxu1 }
 0x3af   :  { %v1148_v47 = vmul.f32 1.442695, %v1361_v40  ;;  %v1152_v48 = vmul.f32 1.442695, %v1140_v41  ;;  %v1063_v50 = vpop.f32.mrb[3].mxu0  ;;  %v1143_v51 = vpop.f32.mrb[23].mxu1 }
 0x3b0   :  { %v1150_v49 = vmul.f32 1.442695, %v1362_v44  ;;  %vm1145_vm12 = vcmp.gt.f32.partialorder %v1361_v40, 0.0  ;;  %vm1147_vm13 = vcmp.gt.f32.partialorder %v1140_v41, 0.0  ;;  %vm1146_vm14 = vcmp.gt.f32.partialorder %v1362_v44, 0.0 }
 0x3b1   :  { %1503 = vpow2.f32 %v1148_v47 }
 0x3b2   :  { %1505 = vpow2.f32 %v1152_v48 }
 0x3b3   :  { %1507 = vpow2.f32 %v1150_v49 }
 0x3bb   :  { %v1504_v52 = vpop.eup %1503 }
 0x3bc   :  { %v1506_v53 = vpop.eup %1505  ;;  %v1335_v56 = vadd.f32 -1.0, %v1504_v52 }
 0x3bd   :  { %v1508_v57 = vpop.eup %1507  ;;  %v1337_v58 = vadd.f32 -1.0, %v1506_v53 }
 0x3be   :  { %v1157_v59 = vsel %vm1145_vm12, %v1361_v40, %v1335_v56  ;;  %v1336_v60 = vadd.f32 -1.0, %v1508_v57 }
 0x3bf   :  { %v1159_v61 = vsel %vm1147_vm13, %v1140_v41, %v1337_v58  ;;  %v1160_v62 = vsel %vm420_vm7, %v1157_v59, 0.0  ;;  %v1168_v55 = vmul.f32 %v1157_v59, %v1157_v59 }
 0x3c0   :  { %v1158_v54 = vsel %vm1146_vm14, %v1362_v44, %v1336_v60  ;;  %v1170_v1 = vmul.f32 %v1159_v61, %v1159_v61  ;;  %v1164_v5 = vsel %vm1163_vm15, %v1159_v61, 0.0 }
 0x3c1   :  { %v1161_v63 = vsel %vm420_vm7, %v1158_v54, 0.0  ;;  %v1169_v0 = vmul.f32 %v1158_v54, %v1158_v54  ;;  %v1171_v3 = vsel %vm420_vm7, %v1168_v55, 0.0 }
 0x3c2   :  { %v1162_v4 = vadd.f32 %v1161_v63, %v1160_v62  ;;  %v1174_v9 = vsel %vm1163_vm15, %v1170_v1, 0.0 }
 0x3c3   :  { %v1172_v6 = vsel %vm420_vm7, %v1169_v0, 0.0 }
 0x3c4   :  { %v1165_v7 = vadd.f32 %v1164_v5, %v1162_v4  ;;  %v1173_v8 = vadd.f32 %v1172_v6, %v1171_v3 }
 0x3c6   :  { %1166 = vadd.xlane.f32.xlu0 %v1165_v7  ;;  %v1175_v10 = vadd.f32 %v1174_v9, %v1173_v8 }
 0x3c8   :  { %1176 = vadd.xlane.f32.xlu1 %v1175_v10 }
 0x453   :  { %v1167_v11 = vpop.xlane.xlu0 %1166 }
 0x454   :  { %v1178_v12 = vmul.f32 0.0033333334, %v1167_v11 }
 0x455   :  { %v1177_v14 = vpop.xlane.xlu1 %1176 }
 0x456   :  { %v1179_v15 = vmul.f32 0.0033333334, %v1177_v14  ;;  %v1180_v16 = vmul.f32 %v1178_v12, %v1178_v12  ;;  %v1182_v24 = vsub.f32 %v1157_v59, %v1178_v12  ;;  %v1183_v25 = vsub.f32 %v1158_v54, %v1178_v12 }
 0x457   :  { %v1184_v26 = vsub.f32 %v1159_v61, %v1178_v12 }
 0x458   :  { %v1181_v17 = vsub.f32 %v1179_v15, %v1180_v16 }
 0x45a   :  { %v1185_v18 = vadd.f32 1e-05, %v1181_v17 }
 0x45c   :  { %1509 = vrsqrt.f32 %v1185_v18 }
 0x466   :  { %v1510_v28 = vpop.eup %1509 }
 0x467   :  { %v1187_v29 = vmul.f32 %v1510_v28, %v1182_v24  ;;  %v1188_v30 = vmul.f32 %v1510_v28, %v1183_v25  ;;  %v1189_v31 = vmul.f32 %v1510_v28, %v1184_v26 }
 0x469   :  { %v1207_v32 = vmul.f32 %v1195_v20, %v1187_v29  ;;  %v1208_v34 = vmul.f32 %v1199_v22, %v1188_v30  ;;  %v1209_v2 = vmul.f32 %v1203_v27, %v1189_v31 }
 0x46b   :  { %v1210_v35 = vsel %vm420_vm7, %v1207_v32, 0.0  ;;  %v1211_v36 = vsel %vm420_vm7, %v1208_v34, 0.0  ;;  %v1213_v21 = vsel %vm1163_vm15, %v1209_v2, 0.0 }
 0x46c   :  { %v1212_v37 = vadd.f32 %v1211_v36, %v1210_v35 }
 0x46e   :  { %v1214_v23 = vadd.f32 %v1213_v21, %v1212_v37 }
 0x470   :  { %1215 = vadd.xlane.f32.xlu0 %v1214_v23 }
 0x4fd   :  { %v1216_v38 = vpop.xlane.xlu0 %1215 }
 0x4fe   :  { %v1224_v33 = vadd.f32 %v1338_v13, %v1216_v38 }
 0x500   :  { %1226 = vst.msk [vmem:[%s1865_s9] sm:$0x3] %vm1225_vm0, %v1224_v33 }
 0x501   :  { %1231 = vsyncpa [#allocation4], 1 }
 0x502   :  { %1232 = vsyncpa [#allocation6], 1 }
 0x503   :  { %1233 = vsyncpa [#allocation9], 1 }

</bundles_post_ra>
